<compile_context>
chip_gen: v7x
topology: tpu7x:2x2x1
jax: 0.10.0
libtpu: 0.0.40
codegen_flags: <defaults>
</compile_context>

<pallas_src>
import functools

import jax
import jax.numpy as jnp
from jax.experimental import pallas as pl
from jax.experimental.pallas import tpu as pltpu


def value_critic_kernel(x_ref, w1_ref, b1_ref, w2_ref, b2_ref, w3_ref, b3_ref,
                        o_ref, *, matmul_dtype):
    # x tile: (block_b, state_dim) -> matmul dtype for the MXU (no-op if already bf16).
    x = x_ref[...].astype(matmul_dtype)

    # Layer 1: Linear + ReLU (f32 accumulation, f32 bias/ReLU).
    h1 = jnp.dot(x, w1_ref[...], preferred_element_type=jnp.float32) + b1_ref[...]
    h1 = jnp.maximum(h1, 0.0)

    # Layer 2: Linear + ReLU.
    h2 = jnp.dot(h1.astype(matmul_dtype), w2_ref[...],
                 preferred_element_type=jnp.float32) + b2_ref[...]
    h2 = jnp.maximum(h2, 0.0)

    # Layer 3: hidden -> 1 as a VPU/XLU lane reduction (keeps the N=1 op off the MXU).
    # w3_ref is the weight column presented as a (1, hidden) f32 row.
    v = jnp.sum(h2 * w3_ref[...], axis=-1) + b3_ref[0, 0]          # (block_b,)

    # Lane-dense store: one (1, block_b) slab per grid step.
    # (sublane->lane relayout of `v` reviewed; amortized under the x-tile DMA.)
    o_ref[...] = v[None, :].astype(o_ref.dtype)


def _round_up(x, m):
    return ((x + m - 1) // m) * m


def _pick_block_b(batch, state_dim, requested=None):
    """Batch tile size: big enough to amortize ~0.35us/step grid overhead, small
    enough for v5e's 16 MiB scoped VMEM, <= batch (standard partial-last-block only),
    and >= 2 grid steps when possible so v7x's 2nd TensorCore isn't idle."""
    if batch < 128:
        return batch                       # single exact tile (block == full dim)

    lane_k = max(state_dim, 128)           # Mosaic lane-pads the K dim to 128
    # Double-buffered f32 x tile (2 * block_b * lane_k * 4 B) kept <= ~8 MiB.
    vmem_cap = (8 * 1024 * 1024) // (2 * lane_k * 4)
    if requested is None:
        requested = 8192 if state_dim < 128 else 4096
    block_b = min(requested, vmem_cap, batch)
    block_b = max(128, (block_b // 128) * 128)

    if block_b * 2 > batch and batch >= 256:
        # A single step (or a lone ragged pair) would leave one v7x TC idle.
        block_b = max(128, _round_up((batch + 1) // 2, 128))
        if block_b > batch:
            block_b = max(128, (batch // 128) * 128)
    return block_b


def prepare_params(params, matmul_dtype=jnp.bfloat16):
    """One-time weight prep, hoisted out of the forward hot path.

    Casts w1/w2 to the MXU dtype, presents w3 as a (1, hidden) f32 row for the
    in-kernel lane reduction, and shapes b3 as a (1, 1) SMEM scalar.
    """
    w1, b1, w2, b2, w3, b3 = params
    hidden_dim = w1.shape[1]
    return (
        w1.astype(matmul_dtype),
        b1.reshape(1, hidden_dim).astype(jnp.float32),
        w2.astype(matmul_dtype),
        b2.reshape(1, hidden_dim).astype(jnp.float32),
        w3.reshape(1, hidden_dim).astype(jnp.float32),
        b3.reshape(1, 1).astype(jnp.float32),
    )


def value_critic_forward(state, prepared_params, *, block_b=None):
    """state: [B, state_dim] (f32, or bf16 if the upstream producer emits it)
    -> [B, 1] float32.  `prepared_params` comes from prepare_params()."""
    w1, b1, w2, b2, w3_row, b3_s = prepared_params
    B, state_dim = state.shape
    hidden_dim = w1.shape[1]
    matmul_dtype = w1.dtype                 # single source of truth for the MXU dtype

    block_b = _pick_block_b(B, state_dim, block_b)
    num_blocks = pl.cdiv(B, block_b)

    # Advisory cost estimate so XLA can overlap surrounding ops with the custom call.
    flops = 2 * B * (state_dim * hidden_dim + hidden_dim * hidden_dim + hidden_dim)
    weight_bytes = (w1.size * w1.dtype.itemsize + w2.size * w2.dtype.itemsize
                    + (b1.size + b2.size + w3_row.size + b3_s.size) * 4)
    bytes_accessed = B * (state_dim * state.dtype.itemsize + 4) + weight_bytes

    kernel = functools.partial(value_critic_kernel, matmul_dtype=matmul_dtype)

    out = pl.pallas_call(
        kernel,
        out_shape=jax.ShapeDtypeStruct((num_blocks, block_b), jnp.float32),
        grid_spec=pltpu.PrefetchScalarGridSpec(
            num_scalar_prefetch=0,
            grid=(num_blocks,),
            in_specs=[
                pl.BlockSpec((block_b, state_dim), lambda i: (i, 0)),      # x tile
                pl.BlockSpec((state_dim, hidden_dim), lambda i: (0, 0)),   # w1 (resident)
                pl.BlockSpec((1, hidden_dim), lambda i: (0, 0)),           # b1
                pl.BlockSpec((hidden_dim, hidden_dim), lambda i: (0, 0)),  # w2 (resident)
                pl.BlockSpec((1, hidden_dim), lambda i: (0, 0)),           # b2
                pl.BlockSpec((1, hidden_dim), lambda i: (0, 0)),           # w3 as row
                pl.BlockSpec(memory_space=pltpu.MemorySpace.SMEM),         # b3 scalar
            ],
            out_specs=pl.BlockSpec((1, block_b), lambda i: (i, 0)),        # lane-dense
        ),
        compiler_params=pltpu.CompilerParams(
            # Batch axis is embarrassingly parallel -> shards across TCs (v7x megacore).
            dimension_semantics=("parallel",),
        ),
        cost_estimate=pl.CostEstimate(flops=flops, transcendentals=0,
                                      bytes_accessed=bytes_accessed),
    )(state, w1, b1, w2, b2, w3_row, b3_s)

    # Ragged tail rows (if any) hold unspecified values; slice them off.
    return out.reshape(num_blocks * block_b, 1)[:B]


def init_params(key, state_dim, hidden_dim):
    """Deterministic init mimicking nn.Linear's U(-1/sqrt(fan_in), 1/sqrt(fan_in))."""
    ks = jax.random.split(key, 6)

    def uniform(k, shape, fan_in):
        bound = 1.0 / jnp.sqrt(jnp.float32(fan_in))
        return jax.random.uniform(k, shape, jnp.float32, -bound, bound)

    w1 = uniform(ks[0], (state_dim, hidden_dim), state_dim)
    b1 = uniform(ks[1], (1, hidden_dim), state_dim)
    w2 = uniform(ks[2], (hidden_dim, hidden_dim), hidden_dim)
    b2 = uniform(ks[3], (1, hidden_dim), hidden_dim)
    w3 = uniform(ks[4], (hidden_dim, 1), hidden_dim)
    b3 = uniform(ks[5], (1, 1), hidden_dim)
    return (w1, b1, w2, b2, w3, b3)


def reference_forward(state, params):
    w1, b1, w2, b2, w3, b3 = params
    h1 = jnp.maximum(state @ w1 + b1, 0.0)
    h2 = jnp.maximum(h1 @ w2 + b2, 0.0)
    return h2 @ w3 + b3


if __name__ == "__main__":
    key = jax.random.PRNGKey(0)
    k_param, k_state = jax.random.split(key)

    state_dim = 32
    hidden_dim = 32  # small shapes for the demo (module default is 256)
    batch = 16       # not a multiple of 128 -> exercises the tiny/exact-tile path

    params = init_params(k_param, state_dim, hidden_dim)
    state = jax.random.normal(k_state, (batch, state_dim), jnp.float32)

    ref = reference_forward(state, params)

    # f32 verification path (still default MXU precision; not a bit-exact f32 FMA).
    out_f32 = jax.block_until_ready(
        value_critic_forward(state, prepare_params(params, jnp.float32)))
    assert out_f32.shape == (batch, 1)
    assert jnp.allclose(out_f32, ref, atol=1e-4, rtol=1e-4), "f32 mismatch vs reference"

    # Production path: bf16 matmuls (x and h1 are also cast to bf16) with f32 accumulation;
    # weight prep is done once, outside the hot path.
    prepped = prepare_params(params)  # bf16
    out_bf16 = jax.block_until_ready(value_critic_forward(state, prepped))
    assert out_bf16.shape == (batch, 1)
    assert jnp.allclose(out_bf16, ref, atol=5e-2, rtol=5e-2), "bf16 mismatch vs reference"

    # Larger, ragged batch to exercise the multi-block + partial-last-tile path.
    batch2 = 300
    state2 = jax.random.normal(jax.random.PRNGKey(1), (batch2, state_dim), jnp.float32)
    out2 = jax.block_until_ready(value_critic_forward(state2, prepped))
    assert out2.shape == (batch2, 1)
    assert jnp.allclose(out2, reference_forward(state2, params), atol=5e-2, rtol=5e-2)

    print("KERNEL_OK")
</pallas_src>

<mosaic_0001>
module attributes {stable_mosaic.version = 11 : i64} {
  func.func @value_critic_kernel(%arg0: i32, %arg1: memref<16x32xf32, #tpu.memory_space<vmem>>, %arg2: memref<32x32xf32, #tpu.memory_space<vmem>>, %arg3: memref<1x32xf32, #tpu.memory_space<vmem>>, %arg4: memref<32x32xf32, #tpu.memory_space<vmem>>, %arg5: memref<1x32xf32, #tpu.memory_space<vmem>>, %arg6: memref<1x32xf32, #tpu.memory_space<vmem>>, %arg7: memref<1x1xf32, #tpu.memory_space<smem>>, %arg8: memref<1x16xf32, #tpu.memory_space<vmem>>) attributes {dimension_semantics = [#tpu.dimension_semantics<parallel>], iteration_bounds = array<i64: 1>, scalar_prefetch = 0 : i64, scratch_operands = 0 : i64, tpu.core_type = #tpu.core_type<tc>, window_params = [{transform_indices = @transform_0, window_bounds = array<i64: 16, 32>}, {pipeline_mode = #tpu.pipeline_mode<synchronous>, transform_indices = @transform_1, window_bounds = array<i64: 32, 32>}, {pipeline_mode = #tpu.pipeline_mode<synchronous>, transform_indices = @transform_2, window_bounds = array<i64: 1, 32>}, {pipeline_mode = #tpu.pipeline_mode<synchronous>, transform_indices = @transform_3, window_bounds = array<i64: 32, 32>}, {pipeline_mode = #tpu.pipeline_mode<synchronous>, transform_indices = @transform_4, window_bounds = array<i64: 1, 32>}, {pipeline_mode = #tpu.pipeline_mode<synchronous>, transform_indices = @transform_5, window_bounds = array<i64: 1, 32>}, {transform_indices = @transform_6, window_bounds = array<i64: 1, 1>}, {transform_indices = @transform_7, window_bounds = array<i64: 1, 16>}]} {
    %c0 = arith.constant 0 : index
    %c0_0 = arith.constant 0 : index
    %0 = vector.load %arg1[%c0, %c0_0] : memref<16x32xf32, #tpu.memory_space<vmem>>, vector<16x32xf32>
    %c0_1 = arith.constant 0 : index
    %c0_2 = arith.constant 0 : index
    %1 = vector.load %arg2[%c0_1, %c0_2] : memref<32x32xf32, #tpu.memory_space<vmem>>, vector<32x32xf32>
    %cst = arith.constant dense<0.000000e+00> : vector<16x32xf32>
    %2 = tpu.matmul %0, %1, %cst {dimension_numbers = #tpu.dot_dimension_numbers<[1], [0], [0], [1], [0, 0, 1, 1], [], []>} : vector<16x32xf32>, vector<32x32xf32>, vector<16x32xf32> -> vector<16x32xf32>
    %c0_3 = arith.constant 0 : index
    %c0_4 = arith.constant 0 : index
    %3 = vector.load %arg3[%c0_3, %c0_4] : memref<1x32xf32, #tpu.memory_space<vmem>>, vector<1x32xf32>
    %4 = vector.broadcast %3 : vector<1x32xf32> to vector<16x32xf32>
    %5 = arith.addf %2, %4 : vector<16x32xf32>
    %cst_5 = arith.constant 0.000000e+00 : f32
    %6 = vector.broadcast %cst_5 : f32 to vector<16x32xf32>
    %7 = arith.maximumf %5, %6 : vector<16x32xf32>
    %c0_6 = arith.constant 0 : index
    %c0_7 = arith.constant 0 : index
    %8 = vector.load %arg4[%c0_6, %c0_7] : memref<32x32xf32, #tpu.memory_space<vmem>>, vector<32x32xf32>
    %cst_8 = arith.constant dense<0.000000e+00> : vector<16x32xf32>
    %9 = tpu.matmul %7, %8, %cst_8 {dimension_numbers = #tpu.dot_dimension_numbers<[1], [0], [0], [1], [0, 0, 1, 1], [], []>} : vector<16x32xf32>, vector<32x32xf32>, vector<16x32xf32> -> vector<16x32xf32>
    %c0_9 = arith.constant 0 : index
    %c0_10 = arith.constant 0 : index
    %10 = vector.load %arg5[%c0_9, %c0_10] : memref<1x32xf32, #tpu.memory_space<vmem>>, vector<1x32xf32>
    %11 = vector.broadcast %10 : vector<1x32xf32> to vector<16x32xf32>
    %12 = arith.addf %9, %11 : vector<16x32xf32>
    %cst_11 = arith.constant 0.000000e+00 : f32
    %13 = vector.broadcast %cst_11 : f32 to vector<16x32xf32>
    %14 = arith.maximumf %12, %13 : vector<16x32xf32>
    %c0_12 = arith.constant 0 : index
    %c0_13 = arith.constant 0 : index
    %15 = vector.load %arg6[%c0_12, %c0_13] : memref<1x32xf32, #tpu.memory_space<vmem>>, vector<1x32xf32>
    %16 = vector.broadcast %15 : vector<1x32xf32> to vector<16x32xf32>
    %17 = arith.mulf %14, %16 : vector<16x32xf32>
    %cst_14 = arith.constant dense<0.000000e+00> : vector<16xf32>
    %18 = vector.multi_reduction <add>, %17, %cst_14 [1] : vector<16x32xf32> to vector<16xf32>
    %c0_15 = arith.constant 0 : index
    %c0_16 = arith.constant 0 : index
    %19 = memref.load %arg7[%c0_15, %c0_16] : memref<1x1xf32, #tpu.memory_space<smem>>
    %20 = vector.broadcast %19 : f32 to vector<16xf32>
    %21 = arith.addf %18, %20 : vector<16xf32>
    %22 = vector.shape_cast %21 : vector<16xf32> to vector<1x16xf32>
    %c0_17 = arith.constant 0 : index
    %c0_18 = arith.constant 0 : index
    %23 = vector.load %arg8[%c0_17, %c0_18] : memref<1x16xf32, #tpu.memory_space<vmem>>, vector<1x16xf32>
    tpu.vector_store %arg8[%c0_17, %c0_18], %22 {strides = array<i32>} : memref<1x16xf32, #tpu.memory_space<vmem>>, vector<1x16xf32>,
    return
  }
  func.func @transform_0(%arg0: i32) -> (i32, i32) {
    %c0_i32 = arith.constant 0 : i32
    %c0_i32_0 = arith.constant 0 : i32
    return %arg0, %c0_i32 : i32, i32
  }
  func.func @transform_1(%arg0: i32) -> (i32, i32) {
    %c0_i32 = arith.constant 0 : i32
    %c0_i32_0 = arith.constant 0 : i32
    %c0_i32_1 = arith.constant 0 : i32
    return %c0_i32, %c0_i32_0 : i32, i32
  }
  func.func @transform_2(%arg0: i32) -> (i32, i32) {
    %c0_i32 = arith.constant 0 : i32
    %c0_i32_0 = arith.constant 0 : i32
    %c0_i32_1 = arith.constant 0 : i32
    return %c0_i32, %c0_i32_0 : i32, i32
  }
  func.func @transform_3(%arg0: i32) -> (i32, i32) {
    %c0_i32 = arith.constant 0 : i32
    %c0_i32_0 = arith.constant 0 : i32
    %c0_i32_1 = arith.constant 0 : i32
    return %c0_i32, %c0_i32_0 : i32, i32
  }
  func.func @transform_4(%arg0: i32) -> (i32, i32) {
    %c0_i32 = arith.constant 0 : i32
    %c0_i32_0 = arith.constant 0 : i32
    %c0_i32_1 = arith.constant 0 : i32
    return %c0_i32, %c0_i32_0 : i32, i32
  }
  func.func @transform_5(%arg0: i32) -> (i32, i32) {
    %c0_i32 = arith.constant 0 : i32
    %c0_i32_0 = arith.constant 0 : i32
    %c0_i32_1 = arith.constant 0 : i32
    return %c0_i32, %c0_i32_0 : i32, i32
  }
  func.func @transform_6(%arg0: i32) -> (i32, i32) {
    %c0_i32 = arith.constant 0 : i32
    %c0_i32_0 = arith.constant 0 : i32
    %c0_i32_1 = arith.constant 0 : i32
    return %c0_i32, %c0_i32_0 : i32, i32
  }
  func.func @transform_7(%arg0: i32) -> (i32, i32) {
    %c0_i32 = arith.constant 0 : i32
    %c0_i32_0 = arith.constant 0 : i32
    return %arg0, %c0_i32 : i32, i32
  }
}

</mosaic_0001>

<bundles_post_ra>
// kernel: tpu_custom_call.1
= control target key start
LH: loop header
LB: loop body
LE: loop exit
PB: predicated region body
PF: predicated region fallthrough
CT: control target
= control target key end

     0   :  { %13 = vsyncpa [#allocation4], 0  ;;  %s598_s0 = inlined_call_operand.hbm [shape: f32[16,32], index: 0, kind: input, shape index: {}]   ;;  %s599_s1 = inlined_call_operand.hbm [shape: f32[32,32], index: 1, kind: input, shape index: {}]   ;;  %s600_s2 = inlined_call_operand.vmem [shape: f32[1,32], index: 2, kind: input, shape index: {}]   ;;  %s601_s3 = inlined_call_operand.hbm [shape: f32[32,32], index: 3, kind: input, shape index: {}]   ;;  %s602_s4 = inlined_call_operand.vmem [shape: f32[1,32], index: 4, kind: input, shape index: {}]   ;;  %s603_s5 = inlined_call_operand.vmem [shape: f32[1,32], index: 5, kind: input, shape index: {}]   ;;  %s604_s6 = inlined_call_operand.<no memory space> [shape: f32[1,1], index: 6, kind: input, shape index: {}]   ;;  %s605_s7 = inlined_call_operand.hbm [shape: f32[1,16], index: 7, kind: output, shape index: {}]  }
   0x1   :  { %14 = vsyncpa [#allocation7], 0 }
   0x2   :  { %15 = vsyncpa [#allocation5], 0  ;;  %s470_s24 = smov [#allocation6]   ;;  %s471_s26 = smov [#allocation3]  }
   0x3   :  { %s33_s25 = sshll.u32 %s470_s24, 4  ;;  %s21_s27 = sshll.u32 %s471_s26, 4  ;;  %s34_s25 = int_to_ptr.vmem [resolvable:$true] %s33_s25  ;;  %s516_s27 = int_to_ptr.vmem [resolvable:$true] %s21_s27 }
   0x4   :  { %s376_s30 = scalar_lea.hbm %s599_s1, 512 }
   0x5   :  { %p377_p0 = scmp.ne.s32.totalorder %s599_s1, %s376_s30  ;;  %p380_p1 = scmp.lt.u32.totalorder %s376_s30, %s599_s1 }
   0x7   :  { %p382_p2 = pnand %p380_p1, %p377_p0 }
   0x9   :  { %385 = shalt.err (!%p382_p2)
}
   0xa   :  { %s386_s12 = scalar_lea.vmem %s34_s25, 512  ;;  %p391_p4 = scmp.lt.s32.totalorder %s34_s25, %s34_s25 }
   0xb   :  { %p387_p3 = scmp.ne.s32.totalorder %s34_s25, %s386_s12  ;;  %p392_p5 = scmp.lt.s32.totalorder %s386_s12, %s386_s12 }
   0xd   :  { %p393_p6 = por %p392_p5, %p391_p4 }
   0xf   :  { %p394_p7 = pnand %p393_p6, %p387_p3 }
  0x11   :  { %397 = shalt.err (!%p394_p7)
}
  0x12   :  { %s472_s13 = smov 128   ;;  %s473_s14 = smov 8  }
  0x13   :  { %39 = dma.hbm_to_vmem [thread:$0]  %s599_s1, 512, %s34_s25, [#allocation7], %s472_s13, %s472_s13, %s473_s14  }
  0x14   :  { %s398_s19 = scalar_lea.hbm %s598_s0, 256 }
  0x15   :  { %p399_p8 = scmp.ne.s32.totalorder %s598_s0, %s398_s19  ;;  %p402_p9 = scmp.lt.u32.totalorder %s398_s19, %s598_s0 }
  0x17   :  { %p404_p10 = pnand %p402_p9, %p399_p8 }
  0x19   :  { %407 = shalt.err (!%p404_p10)
}
  0x1a   :  { %s408_s24 = scalar_lea.vmem %s516_s27, 256  ;;  %p413_p12 = scmp.lt.s32.totalorder %s516_s27, %s516_s27 }
  0x1b   :  { %p409_p11 = scmp.ne.s32.totalorder %s516_s27, %s408_s24  ;;  %p414_p13 = scmp.lt.s32.totalorder %s408_s24, %s408_s24 }
  0x1d   :  { %p415_p0 = por %p414_p13, %p413_p12 }
  0x1f   :  { %p416_p1 = pnand %p415_p0, %p409_p11 }
  0x21   :  { %419 = shalt.err (!%p416_p1)
}
  0x22   :  { %27 = dma.hbm_to_vmem [thread:$0]  %s598_s0, 256, %s516_s27, [#allocation4], %s472_s13, %s472_s13, %s473_s14  }
  0x23   :  { %s474_s26 = smov [#allocation8]   ;;  %s420_s8 = scalar_lea.hbm %s601_s3, 512 }
  0x24   :  { %s47_s28 = sshll.u32 %s474_s26, 4  ;;  %p421_p2 = scmp.ne.s32.totalorder %s601_s3, %s420_s8  ;;  %s48_s28 = int_to_ptr.vmem [resolvable:$true] %s47_s28 }
  0x25   :  { %p424_p3 = scmp.lt.u32.totalorder %s420_s8, %s601_s3 }
  0x27   :  { %p426_p4 = pnand %p424_p3, %p421_p2 }
  0x29   :  { %429 = shalt.err (!%p426_p4)
}
  0x2a   :  { %s430_s15 = scalar_lea.vmem %s48_s28, 512  ;;  %p435_p6 = scmp.lt.s32.totalorder %s48_s28, %s48_s28 }
  0x2b   :  { %p431_p5 = scmp.ne.s32.totalorder %s48_s28, %s430_s15  ;;  %p436_p7 = scmp.lt.s32.totalorder %s430_s15, %s430_s15 }
  0x2d   :  { %p437_p8 = por %p436_p7, %p435_p6 }
  0x2f   :  { %p438_p9 = pnand %p437_p8, %p431_p5 }
  0x31   :  { %441 = shalt.err (!%p438_p9)
}
  0x32   :  { %53 = dma.hbm_to_vmem [thread:$0]  %s601_s3, 512, %s48_s28, [#allocation7], %s472_s13, %s472_s13, %s473_s14  }
  0x33   :  { %464 = dma.done.wait [#allocation4], 256  }
  0x34   :  { %465 = vsyncadd [#allocation4], 4294967040 }
  0x35   :  { %466 = dma.done.wait [#allocation7], 1024  }
  0x36   :  { %467 = vsyncadd [#allocation7], 4294966272  ;;  %vm82_vm0 = vcmask 261120   ;;  %v71_v0 = vld [vmem:[#allocation6] sm:$0xff]  ;;  %v72_v1 = vld [vmem:[#allocation6 + $0x8] sm:$0xff]  ;;  %v281_v33 = vlaneseq  ;;  %v276_v37 = vstv %s604_s6  ;;  %vm292_vm1 = vcmask 130112  }
  0x37   :  { %v73_v2 = vld [vmem:[#allocation6 + $0x10] sm:$0xff]  ;;  %v354_v3 = vpack.c.bf16 %v72_v1, %v71_v0  ;;  %v74_v4 = vld [vmem:[#allocation6 + $0x18] sm:$0xff]  ;;  %v166_v7 = vld [vmem:[#allocation8] sm:$0xff]  ;;  %vm295_vm2 = vcmask 122880  }
  0x38   :  { %v69_v5 = vld [vmem:[#allocation3] sm:$0xff]  ;;  %v358_v6 = vpack.c.bf16 %v74_v4, %v73_v2  ;;  %v167_v8 = vld [vmem:[#allocation8 + $0x8] sm:$0xff]  ;;  %v70_v10 = vld [vmem:[#allocation3 + $0x8] sm:$0xff]  ;;  %v282_v34 = vand.u32 127, %v281_v33  ;;  %v284_v35 = vshrl.u32 %v281_v33, 7 }
  0x39   :  { %340 = vmatprep.mubr.msk.f32.mxu0 %vm82_vm0, %v69_v5  ;;  %355 = vmatprep.subr.bf16.mxu0 %v354_v3  ;;  %v362_v9 = vpack.c.bf16 %v167_v8, %v166_v7  ;;  %v168_v11 = vld [vmem:[#allocation8 + $0x10] sm:$0xff]  ;;  %v169_v12 = vld [vmem:[#allocation8 + $0x18] sm:$0xff] }
  0x3a   :  { %357 = vmatpush3.bf16.msra.mxu0 %v354_v3  ;;  %v366_v13 = vpack.c.bf16 %v169_v12, %v168_v11  ;;  %v313_v14 = vld [vmem:[%s600_s2] ss:$0 sm:$0xff]  ;;  %v287_v36 = vadd.s32 4294967288, %v282_v34  ;;  %v285_v39 = vsub.s32 %v282_v34, %v284_v35 }
  0x3b   :  { %359 = vmatprep.subr.bf16.mxu0 %v358_v6  ;;  %363 = vmatprep.subr.bf16.mxu1 %v362_v9  ;;  %v316_v21 = vld [vmem:[%s602_s4] ss:$0 sm:$0xff] }
  0x3c   :  { %365 = vmatpush3.bf16.msra.mxu1 %v362_v9  ;;  %v319_v26 = vld [vmem:[%s603_s5] ss:$0 sm:$0xff]  ;;  %v290_v41 = vsub.s32 %v287_v36, %v284_v35  ;;  %s475_s5 = smov [#allocation9]  }
  0x3d   :  { %367 = vmatprep.subr.bf16.mxu1 %v366_v13  ;;  %s303_s19 = sshll.u32 %s475_s5, 4  ;;  %s304_s19 = int_to_ptr.vmem [resolvable:$true] %s303_s19 }
  0x3e   :  { %361 = vmatpush3.bf16.msra.mxu0 %v358_v6  ;;  %s442_s20 = scalar_lea.vmem %s304_s19, 16  ;;  %s446_s21 = scalar_lea.vmem %s304_s19, 32 }
  0x3f   :  { %p443_p10 = scmp.ne.s32.totalorder %s304_s19, %s442_s20  ;;  %p447_p11 = scmp.lt.s32.totalorder %s304_s19, %s304_s19 }
  0x40   :  { %369 = vmatpush3.bf16.msra.mxu1 %v366_v13  ;;  %p448_p12 = scmp.lt.s32.totalorder %s446_s21, %s442_s20 }
  0x41   :  { %341 = vmatmul.mubr.msk.f32.vlgmr.msra.gmra.mrb[0].mxu0 %vm82_vm0, %v70_v10 }
  0x42   :  { %p449_p13 = por %p448_p12, %p447_p11 }
  0x44   :  { %p450_p0 = pnand %p449_p13, %p443_p10 }
 0x114   :  { %v342_v15 = vpop.f32.mrb[0].mxu0 }
 0x115   :  { %v161_v16 = vadd.f32 %v342_v15, %v313_v14  ;;  %v155_v17 = vpop.f32.mrb[1].mxu0 }
 0x116   :  { %v156_v18 = vadd.f32 %v313_v14, %v155_v17 }
 0x117   :  { %v165_v20 = vmax.f32 %v161_v16, 0.0 }
 0x118   :  { %v164_v19 = vmax.f32 %v156_v18, 0.0 }
 0x11a   :  { %351 = vmatprep.mubr.msk.f32.mxu1 %vm82_vm0, %v164_v19 }
 0x11b   :  { %352 = vmatmul.mubr.msk.f32.vlgmr.msra.gmra.mrb[0].mxu1 %vm82_vm0, %v165_v20 }
 0x1ee   :  { %v353_v22 = vpop.f32.mrb[0].mxu1 }
 0x1ef   :  { %v255_v23 = vadd.f32 %v353_v22, %v316_v21  ;;  %v249_v24 = vpop.f32.mrb[1].mxu1 }
 0x1f0   :  { %v250_v25 = vadd.f32 %v316_v21, %v249_v24 }
 0x1f1   :  { %v259_v27 = vmax.f32 %v255_v23, 0.0 }
 0x1f2   :  { %v258_v28 = vmax.f32 %v250_v25, 0.0 }
 0x1f3   :  { %v268_v31 = vmul.f32 %v319_v26, %v259_v27 }
 0x1f4   :  { %v267_v29 = vmul.f32 %v319_v26, %v258_v28 }
 0x1f5   :  { %v272_v32 = vsel %vm82_vm0, %v268_v31, 0.0 }
 0x1f6   :  { %v269_v30 = vsel %vm82_vm0, %v267_v29, 0.0 }
 0x1f7   :  { %270 = vadd.xlane.f32.xlu0 %v269_v30 }
 0x1fb   :  { %273 = vadd.xlane.f32.xlu0 %v272_v32 }
 0x284   :  { %v271_v38 = vpop.xlane.xlu0 %270 }
 0x285   :  { %v277_v40 = vadd.f32 %v276_v37, %v271_v38 }
 0x287   :  { %v286_v44 = vrot.slane %v277_v40, %v285_v39 }
 0x288   :  { %v274_v42 = vpop.xlane.xlu0 %273 }
 0x289   :  { %v278_v43 = vadd.f32 %v276_v37, %v274_v42 }
 0x28b   :  { %v291_v45 = vrot.slane %v278_v43, %v290_v41 }
 0x28d   :  { %v293_v46 = vsel %vm292_vm1, %v291_v45, %v286_v44 }
 0x28e   :  { %296 = vst.msk [vmem:[#allocation9] sm:$0x1] %vm295_vm2, %v293_v46 }
 0x28f   :  { %453 = shalt.err (!%p450_p0)
}
 0x290   :  { %s454_s23 = scalar_lea.hbm %s605_s7, 16 }
 0x291   :  { %p455_p1 = scmp.ne.s32.totalorder %s605_s7, %s454_s23  ;;  %p458_p2 = scmp.lt.u32.totalorder %s454_s23, %s605_s7 }
 0x293   :  { %p460_p3 = pnand %p458_p2, %p455_p1 }
 0x295   :  { %463 = shalt.err (!%p460_p3)
}
 0x296   :  { %306 = dma.vmem_to_hbm [thread:$0]  %s304_s19, 16, %s605_s7, [#allocation5]  }
 0x297   :  { %468 = dma.done.wait [#allocation5], 16  }
 0x298   :  { %469 = vsyncadd [#allocation5], 4294967280 }
 0x299   :  { %310 = vsyncpa [#allocation4], 1 }
 0x29a   :  { %311 = vsyncpa [#allocation7], 1 }
 0x29b   :  { %312 = vsyncpa [#allocation5], 1 }

</bundles_post_ra>
